<compile_context>
chip_gen: v5e
topology: v5e:2x2
jax: 0.10.0
libtpu: 0.0.40
codegen_flags: <defaults>
</compile_context>

<pallas_src>
import math
from functools import partial

import jax
import jax.numpy as jnp
from jax.experimental import pallas as pl
from jax.experimental.pallas import tpu as pltpu


def _qkv_attention_kernel(q_ref, k_ref, v_ref, o_ref, *, scale):
    # q_ref: [C, tq]   k_ref: [C, T]   v_ref: [C, T]   o_ref: [C, tq]
    q = q_ref[...].astype(jnp.float32) * scale
    k = k_ref[...].astype(jnp.float32) * scale

    # weight[t, s] = sum_c q[c, t] * k[c, s]      -> [tq, T]   (MXU)
    w = jax.lax.dot_general(
        q, k, (((0,), (0,)), ((), ())), preferred_element_type=jnp.float32)

    # softmax over s, in float32 (matches reference `.float()` then cast back)
    w = w - jnp.max(w, axis=-1, keepdims=True)
    w = jnp.exp(w)
    w = w / jnp.sum(w, axis=-1, keepdims=True)

    # a[c, t] = sum_s v[c, s] * weight[t, s]      -> [C, tq]   (MXU)
    v = v_ref[...].astype(jnp.float32)
    a = jax.lax.dot_general(
        v, w, (((1,), (1,)), ((), ())), preferred_element_type=jnp.float32)

    o_ref[...] = a.astype(o_ref.dtype)


def qkv_attention_legacy(qkv, n_heads, *, tq=None):
    """Pallas equivalent of QKVAttentionLegacy(n_heads)(qkv)."""
    bs, width, length = qkv.shape
    assert width % (3 * n_heads) == 0
    ch = width // (3 * n_heads)
    B = bs * n_heads
    scale = 1.0 / math.sqrt(math.sqrt(ch))

    # [N, H*3*C, T] -> [B, 3, C, T] -> q/k/v each [B, C, T]  (layout plumbing in XLA)
    qkv4 = qkv.reshape(B, 3, ch, length)
    q, k, v = qkv4[:, 0], qkv4[:, 1], qkv4[:, 2]

    # Query-tile size: multiple of 128 lanes, or the full length for small T.
    if tq is None:
        if length % 128 == 0:
            tq = next(t for t in (512, 256, 128) if length % t == 0)
        else:
            tq = length
    assert length % tq == 0

    grid = (B, length // tq)

    out = pl.pallas_call(
        partial(_qkv_attention_kernel, scale=scale),
        out_shape=jax.ShapeDtypeStruct((B, ch, length), qkv.dtype),
        grid_spec=pltpu.PrefetchScalarGridSpec(
            num_scalar_prefetch=0,
            grid=grid,
            in_specs=[
                pl.BlockSpec((None, ch, tq), lambda b, qi: (b, 0, qi)),      # q tile
                pl.BlockSpec((None, ch, length), lambda b, qi: (b, 0, 0)),   # full K
                pl.BlockSpec((None, ch, length), lambda b, qi: (b, 0, 0)),   # full V
            ],
            out_specs=pl.BlockSpec((None, ch, tq), lambda b, qi: (b, 0, qi)),
        ),
        compiler_params=pltpu.CompilerParams(
            dimension_semantics=("parallel", "parallel")),
    )(q, k, v)

    return out.reshape(bs, n_heads * ch, length)


class QKVAttentionLegacy:
    """JAX/Pallas port of the PyTorch QKVAttentionLegacy module."""

    def __init__(self, n_heads):
        self.n_heads = n_heads

    def __call__(self, qkv):
        return qkv_attention_legacy(qkv, self.n_heads)


def _reference(qkv, n_heads):
    bs, width, length = qkv.shape
    ch = width // (3 * n_heads)
    qkv3 = qkv.reshape(bs * n_heads, 3 * ch, length)
    q, k, v = jnp.split(qkv3, 3, axis=1)
    scale = 1.0 / math.sqrt(math.sqrt(ch))
    w = jnp.einsum('bct,bcs->bts', q * scale, k * scale)
    w = jax.nn.softmax(w.astype(jnp.float32), axis=-1).astype(w.dtype)
    a = jnp.einsum('bts,bcs->bct', w, v)
    return a.reshape(bs, -1, length)


if __name__ == "__main__":
    key = jax.random.PRNGKey(0)
    N, H, C, T = 2, 4, 32, 64          # small shapes: width = H*3*C = 384
    qkv = jax.random.normal(key, (N, H * 3 * C, T), dtype=jnp.float32)

    mod = QKVAttentionLegacy(H)
    out = mod(qkv)
    jax.block_until_ready(out)

    ref = _reference(qkv, H)
    assert out.shape == (N, H * C, T) and out.dtype == qkv.dtype
    assert jnp.allclose(out, ref, atol=2e-5, rtol=2e-5)
    print("KERNEL_OK")
</pallas_src>

<mosaic_0001>
module attributes {stable_mosaic.version = 11 : i64} {
  func.func @_qkv_attention_kernel(%arg0: i32, %arg1: i32, %arg2: memref<1x32x64xf32, #tpu.memory_space<vmem>>, %arg3: memref<1x32x64xf32, #tpu.memory_space<vmem>>, %arg4: memref<1x32x64xf32, #tpu.memory_space<vmem>>, %arg5: memref<1x32x64xf32, #tpu.memory_space<vmem>>) attributes {dimension_semantics = [#tpu.dimension_semantics<parallel>, #tpu.dimension_semantics<parallel>], iteration_bounds = array<i64: 8, 1>, scalar_prefetch = 0 : i64, scratch_operands = 0 : i64, tpu.core_type = #tpu.core_type<tc>, window_params = [{transform_indices = @transform_0, window_bounds = array<i64: 1, 32, 64>}, {transform_indices = @transform_1, window_bounds = array<i64: 1, 32, 64>}, {transform_indices = @transform_2, window_bounds = array<i64: 1, 32, 64>}, {transform_indices = @transform_3, window_bounds = array<i64: 1, 32, 64>}]} {
    %c0 = arith.constant 0 : index
    %c0_0 = arith.constant 0 : index
    %c0_1 = arith.constant 0 : index
    %0 = vector.load %arg2[%c0, %c0_0, %c0_1] : memref<1x32x64xf32, #tpu.memory_space<vmem>>, vector<1x32x64xf32>
    %1 = vector.shape_cast %0 : vector<1x32x64xf32> to vector<32x64xf32>
    %cst = arith.constant 0.420448214 : f32
    %2 = vector.broadcast %cst : f32 to vector<32x64xf32>
    %3 = arith.mulf %1, %2 : vector<32x64xf32>
    %c0_2 = arith.constant 0 : index
    %c0_3 = arith.constant 0 : index
    %c0_4 = arith.constant 0 : index
    %4 = vector.load %arg3[%c0_2, %c0_3, %c0_4] : memref<1x32x64xf32, #tpu.memory_space<vmem>>, vector<1x32x64xf32>
    %5 = vector.shape_cast %4 : vector<1x32x64xf32> to vector<32x64xf32>
    %cst_5 = arith.constant 0.420448214 : f32
    %6 = vector.broadcast %cst_5 : f32 to vector<32x64xf32>
    %7 = arith.mulf %5, %6 : vector<32x64xf32>
    %cst_6 = arith.constant dense<0.000000e+00> : vector<64x64xf32>
    %8 = tpu.matmul %3, %7, %cst_6 {dimension_numbers = #tpu.dot_dimension_numbers<[0], [0], [1], [1], [0, 1, 1, 1], [], []>} : vector<32x64xf32>, vector<32x64xf32>, vector<64x64xf32> -> vector<64x64xf32>
    %cst_7 = arith.constant dense<0xFF800000> : vector<64xf32>
    %9 = vector.multi_reduction <maximumf>, %8, %cst_7 [1] : vector<64x64xf32> to vector<64xf32>
    %10 = vector.shape_cast %9 : vector<64xf32> to vector<64x1xf32>
    %11 = vector.broadcast %10 : vector<64x1xf32> to vector<64x64xf32>
    %12 = arith.subf %8, %11 : vector<64x64xf32>
    %13 = math.exp %12 : vector<64x64xf32>
    %cst_8 = arith.constant dense<0.000000e+00> : vector<64xf32>
    %14 = vector.multi_reduction <add>, %13, %cst_8 [1] : vector<64x64xf32> to vector<64xf32>
    %15 = vector.shape_cast %14 : vector<64xf32> to vector<64x1xf32>
    %16 = vector.broadcast %15 : vector<64x1xf32> to vector<64x64xf32>
    %17 = arith.divf %13, %16 : vector<64x64xf32>
    %c0_9 = arith.constant 0 : index
    %c0_10 = arith.constant 0 : index
    %c0_11 = arith.constant 0 : index
    %18 = vector.load %arg4[%c0_9, %c0_10, %c0_11] : memref<1x32x64xf32, #tpu.memory_space<vmem>>, vector<1x32x64xf32>
    %19 = vector.shape_cast %18 : vector<1x32x64xf32> to vector<32x64xf32>
    %cst_12 = arith.constant dense<0.000000e+00> : vector<32x64xf32>
    %20 = tpu.matmul %19, %17, %cst_12 {dimension_numbers = #tpu.dot_dimension_numbers<[1], [1], [0], [0], [0, 0, 1, 0], [], []>} : vector<32x64xf32>, vector<64x64xf32>, vector<32x64xf32> -> vector<32x64xf32>
    %c0_13 = arith.constant 0 : index
    %c0_14 = arith.constant 0 : index
    %c0_15 = arith.constant 0 : index
    %21 = vector.load %arg5[%c0_13, %c0_14, %c0_15] : memref<1x32x64xf32, #tpu.memory_space<vmem>>, vector<1x32x64xf32>
    %22 = vector.shape_cast %21 : vector<1x32x64xf32> to vector<32x64xf32>
    %23 = vector.shape_cast %20 : vector<32x64xf32> to vector<1x32x64xf32>
    tpu.vector_store %arg5[%c0_13, %c0_14, %c0_15], %23 {strides = array<i32>} : memref<1x32x64xf32, #tpu.memory_space<vmem>>, vector<1x32x64xf32>,
    return
  }
  func.func @transform_0(%arg0: i32, %arg1: i32) -> (i32, i32, i32) {
    %c0_i32 = arith.constant 0 : i32
    %c0_i32_0 = arith.constant 0 : i32
    return %arg0, %c0_i32, %arg1 : i32, i32, i32
  }
  func.func @transform_1(%arg0: i32, %arg1: i32) -> (i32, i32, i32) {
    %c0_i32 = arith.constant 0 : i32
    %c0_i32_0 = arith.constant 0 : i32
    %c0_i32_1 = arith.constant 0 : i32
    return %arg0, %c0_i32, %c0_i32_0 : i32, i32, i32
  }
  func.func @transform_2(%arg0: i32, %arg1: i32) -> (i32, i32, i32) {
    %c0_i32 = arith.constant 0 : i32
    %c0_i32_0 = arith.constant 0 : i32
    %c0_i32_1 = arith.constant 0 : i32
    return %arg0, %c0_i32, %c0_i32_0 : i32, i32, i32
  }
  func.func @transform_3(%arg0: i32, %arg1: i32) -> (i32, i32, i32) {
    %c0_i32 = arith.constant 0 : i32
    %c0_i32_0 = arith.constant 0 : i32
    return %arg0, %c0_i32, %arg1 : i32, i32, i32
  }
}

</mosaic_0001>

<bundles_post_ra>
// kernel: tpu_custom_call.1
= control target key start
LH: loop header
LB: loop body
LE: loop exit
PB: predicated region body
PF: predicated region fallthrough
CT: control target
= control target key end

     0   :  { %s1495_s0 = inlined_call_operand.hbm [shape: f32[8,32,64], index: 0, kind: input, shape index: {}]   ;;  %s1496_s1 = inlined_call_operand.hbm [shape: f32[8,32,64], index: 1, kind: input, shape index: {}]   ;;  %s1497_s2 = inlined_call_operand.hbm [shape: f32[8,32,64], index: 2, kind: input, shape index: {}]   ;;  %s1498_s3 = inlined_call_operand.hbm [shape: f32[8,32,64], index: 3, kind: output, shape index: {}]  }
   0x1   :  { %1503 = sst [smem:[#allocation17_spill]] %s1496_s1 }
   0x2   :  { %8 = vsyncpa [#allocation3], 0 }
   0x3   :  { %10 = vsyncpa [#allocation3 + $0x1], 0 }
   0x4   :  { %11 = vsyncpa [#allocation6], 0 }
   0x5   :  { %13 = vsyncpa [#allocation6 + $0x1], 0 }
   0x6   :  { %14 = vsyncpa [#allocation4], 0 }
   0x7   :  { %16 = vsyncpa [#allocation4 + $0x1], 0  ;;  %s1184_s12 = smov 0   ;;  %s1186_s13 = smov 0  }
   0x8   :  { %s1188_s14 = smov 0   ;;  %s1190_s15 = smov 0  }
   0x9   :  { %s1192_s16 = smov 0   ;;  %s1194_s17 = smov 0  }
   0xa LB: > { %1504 = sst [smem:[#allocation12_spill]] %s1146_s14  ;;  %s1215_s18 = sadd.s32 4294967295, %s1158_s17   ;;  %s1158_s17 = sphi %s1194_s17, %s22_s17   ;;  %s1154_s16 = sphi %s1192_s16, %s1522_s16   ;;  %s1150_s15 = sphi %s1190_s15, %s1521_s15   ;;  %s1146_s14 = sphi %s1188_s14, %s1525_s14   ;;  %s1142_s13 = sphi %s1186_s13, %s1524_s13   ;;  %s1138_s12 = sphi %s1184_s12, %s1523_s12  }
   0xb   : > { %1505 = sst [smem:[#allocation13_spill]] %s1154_s16  ;;  %s815_s19 = sadd.s32 4294967294, %s1158_s17  }
   0xc   : > { %s34_s20 = sadd.s32 1, %s1154_s16  ;;  %s43_s21 = sadd.s32 1, %s1146_s14 }
   0xd   : > { %p36_p0 = scmp.ge.s32.totalorder %s34_s20, 8  ;;  %p50_p1 = scmp.ne.s32.totalorder %s1146_s14, %s1142_s13 }
   0xe   : > { %p51_p2 = scmp.eq.s32.totalorder %s1158_s17, 0  ;;  %p56_p3 = scmp.ne.s32.totalorder %s1142_s13, %s1138_s12 }
   0xf   : > { %s1527_s20 = smov (%p36_p0, %s34_s20), 0  ;;  %p57_p5 = scmp.eq.s32.totalorder %s1215_s18, 0 }
  0x10   : > { %1506 = sst [smem:[#allocation14_spill]] %s1527_s20  ;;  %p1227_p4 = por %p51_p2, %p50_p1 }
  0x11   : > { %s38_s23 = ssub.s32 %s1154_s16, %s1527_s20  ;;  %p134_p6 = scmp.eq.s32.totalorder %s1215_s18, 7 }
  0x12   : > { %p41_p7 = scmp.eq.s32.totalorder %s38_s23, 0  ;;  %p1235_p8 = por %p57_p5, %p56_p3 }
  0x13   : > { %p1239_p9 = por %p134_p6, %p50_p1  ;;  %p140_p10 = scmp.eq.s32.totalorder %s815_s19, 7 }
  0x14   : > { %s1244_s26 = scalar_select %p41_p7, %s1146_s14, %s43_s21  }
  0x15   : > { %p1246_p11 = por %p140_p10, %p56_p3  ;;  %p895_p12 = scmp.lt.s32.totalorder %s1158_s17, 8 }
  0x16   : > { %1510 = sst [smem:[#allocation15_spill]] %s1244_s26  ;;  %s160_s28 = sand.u32 1, %s1146_s14  }
  0x17   : > { %s1511_s27 = scalar_select %p1246_p11, 1, 0 }
  0x18   : > { %s1252_s29 = sshll.u32 %s160_s28, 5  ;;  %s857_s30 = sshll.u32 %s1154_s16, 5 }
  0x19   : > { %1512 = sst [smem:[#allocation16_spill]] %s1511_s27  ;;  %p1257_p13 = pnand %p895_p12, %p1227_p4 }
  0x1a   : > { %s183_s5 = sand.u32 1, %s1158_s17   ;;  %s1514_s1 = sld [smem:[#allocation17_spill]] }
  0x1b   : > { %s187_s10 = scalar_lea.vmem [#allocation5], %s1252_s29  ;;  %s184_s19 = scalar_lea.sflag [#allocation6], %s183_s5 }
  0x1c   : > { %s195_s11 = sshll.u32 %s187_s10, 4  ;;  %s1160_s21 = smov 128   ;;  %s196_s11 = int_to_ptr.vmem [resolvable:$true] %s195_s11 }
  0x1d   : > { %s1161_s22 = smov 8   ;;  %p827_p0 = scmp.ge.s32.totalorder %s1158_s17, 1 }
  0x1e   : > { %p225_p1 = scmp.lt.s32.totalorder %s1158_s17, 9  ;;  %s161_s5 = scalar_lea.sflag [#allocation3], %s160_s28 }
  0x1f   : > { %s214_s16 = scalar_lea.hbm %s1497_s2, %s857_s30  ;;  %s209_s14 = scalar_lea.vmem [#allocation7], %s1252_s29 }
  0x20   : > { %s192_s8 = scalar_lea.hbm %s1514_s1, %s857_s30  ;;  %p1270_p2 = pnand %p827_p0, %p225_p1 }
  0x21   : > { %s193_s9 = sshll.u32 %s192_s8, 4  ;;  %s170_s8 = scalar_lea.hbm %s1495_s0, %s857_s30  ;;  %s194_s9 = int_to_ptr.hbm [resolvable:$true] %s193_s9 }
  0x22   : > { %887 = dma.hbm_to_vmem [thread:$0]  (!%p1257_p13), %s194_s9, 512, %s196_s11, %s184_s19, %s1160_s21, %s1160_s21, %s1161_s22  }
  0x23   : > { %s171_s10 = sshll.u32 %s170_s8, 4  ;;  %s164_s1 = scalar_lea.vmem [#allocation2], %s1252_s29  ;;  %s172_s10 = int_to_ptr.hbm [resolvable:$true] %s171_s10 }
  0x24   : > { %s173_s20 = sshll.u32 %s164_s1, 4  ;;  %s215_s26 = sshll.u32 %s214_s16, 4  ;;  %s174_s20 = int_to_ptr.vmem [resolvable:$true] %s173_s20  ;;  %s216_s26 = int_to_ptr.hbm [resolvable:$true] %s215_s26 }
  0x25   : > { %884 = dma.hbm_to_vmem [thread:$0]  (!%p1257_p13), %s172_s10, 512, %s174_s20, %s161_s5, %s1160_s21, %s1160_s21, %s1161_s22  }
  0x26   : > { %s217_s27 = sshll.u32 %s209_s14, 4  ;;  %229 = sbr.rel (%p1270_p2) target bundleno = 847 (0x34f), region = 32  ;;  %s218_s27 = int_to_ptr.vmem [resolvable:$true] %s217_s27 }
  0x27   : > { %890 = dma.hbm_to_vmem [thread:$0]  (!%p1257_p13), %s216_s26, 512, %s218_s27, %s184_s19, %s1160_s21, %s1160_s21, %s1161_s22  }
  0x28   : > { %s1289_s1 = sand.u32 (!%p1270_p2), 1, %s1142_s13  }
  0x29   : > { %s1292_s20 = sshll.u32 (!%p1270_p2), %s1289_s1, 5  ;;  %s232_s28 = scalar_lea.sflag (!%p1270_p2), [#allocation3], %s1289_s1 }
  0x2a   : > { %s1296_s16 = scalar_lea.vmem (!%p1270_p2), [#allocation2], %s1292_s20 }
  0x2b   : > { %1125 = dma.done.wait (%p1235_p8), %s232_s28, 512  }
  0x2c   : > { %1127 = vsyncadd (%p1235_p8), %s232_s28, 4294966784  ;;  %s241_s14 = sand.u32 1, %s1215_s18   ;;  %s245_s27 = scalar_lea.vmem [#allocation5], %s1292_s20 }
  0x2d   : > { %s242_s26 = scalar_lea.sflag [#allocation6], %s241_s14 }
  0x2e   : > { %1129 = dma.done.wait (%p1235_p8), %s242_s26, 1024  }
  0x2f   : > { %1131 = vsyncadd (%p1235_p8), %s242_s26, 4294966272  ;;  %v289_v0 = vld [vmem:[%s1296_s16] sm:$0xff]  ;;  %v300_v2 = vld [vmem:[%s245_s27 + $0x18] sm:$0xff]  ;;  %vm337_vm0 = vcmask 261120   ;;  %vm403_vm1 = vcmask 523264   ;;  %s255_s18 = scalar_lea.vmem [#allocation7], %s1292_s20 }
  0x30   : > { %v293_v1 = vmul.f32 0.4204482, %v289_v0  ;;  %v299_v3 = vld [vmem:[%s245_s27 + $0x10] sm:$0xff]  ;;  %v304_v4 = vmul.f32 0.4204482, %v300_v2  ;;  %v298_v5 = vld [vmem:[%s245_s27 + $0x8] sm:$0xff] }
  0x31   : > { %v290_v6 = vld [vmem:[%s1296_s16 + $0x8] sm:$0xff]  ;;  %v303_v7 = vmul.f32 0.4204482, %v299_v3  ;;  %v297_v8 = vld [vmem:[%s245_s27] sm:$0xff]  ;;  %v302_v9 = vmul.f32 0.4204482, %v298_v5 }
  0x32   : > { %305 = vxpose.xlu0.b32.start [1/4] (short) (narrow) %v293_v1, 64  ;;  %374 = vmatpush.msra.mxu0 %v304_v4  ;;  %v294_v10 = vmul.f32 0.4204482, %v290_v6  ;;  %v301_v11 = vmul.f32 0.4204482, %v297_v8  ;;  %v291_v12 = vld [vmem:[%s1296_s16 + $0x10] sm:$0xff] }
  0x33   : > { %861 = vmatpush.msra.mxu2 %v304_v4  ;;  %v295_v13 = vmul.f32 0.4204482, %v291_v12  ;;  %v292_v14 = vld [vmem:[%s1296_s16 + $0x18] sm:$0xff]  ;;  %s288_s24 = scalar_lea.vmem [#allocation8], %s1292_s20  ;;  %s860_s29 = sshll.u32 %s1150_s15, 5 }
  0x34   : > { %375 = vmatpush.msra.mxu0 %v303_v7  ;;  %v296_v15 = vmul.f32 0.4204482, %v292_v14  ;;  %s682_s19 = scalar_lea.hbm %s1498_s3, %s860_s29  ;;  %s683_s21 = sshll.u32 %s288_s24, 4  ;;  %s684_s21 = int_to_ptr.vmem [resolvable:$true] %s683_s21 }
  0x35   : > { %862 = vmatpush.msra.mxu2 %v303_v7  ;;  %s685_s22 = sshll.u32 %s682_s19, 4  ;;  %s670_s23 = scalar_lea.sflag [#allocation4], %s1289_s1  ;;  %s686_s22 = int_to_ptr.hbm [resolvable:$true] %s685_s22 }
  0x36   : > { %376 = vmatpush.msra.mxu0 %v302_v9  ;;  %s1086_s15 = sshra.s32 %s686_s22, 4  ;;  %s1092_s10 = scalar_lea.hbm %s1498_s3, 256  ;;  %s1087_s15 = int_to_ptr.hbm [resolvable:$true] %s1086_s15 }
  0x37   : > { %863 = vmatpush.msra.mxu2 %v302_v9  ;;  %s1088_s6 = scalar_lea.hbm %s1087_s15, 32  ;;  %p1093_p6 = scmp.lt.s32.totalorder %s1087_s15, %s1498_s3 }
  0x38   : > { %377 = vmatpush.msra.mxu0 %v301_v11  ;;  %p1089_p3 = scmp.ne.s32.totalorder %s1087_s15, %s1088_s6  ;;  %p1094_p7 = scmp.lt.s32.totalorder %s1092_s10, %s1088_s6 }
  0x39   : > { %864 = vmatpush.msra.mxu2 %v301_v11 }
  0x3a   : > { %306 = vxpose.xlu0.b32.cont [2/4] (short) (narrow) %v294_v10, 64  ;;  %p1090_p4 = pnand %p1089_p3, %p1239_p9  ;;  %p1095_p8 = por %p1094_p7, %p1093_p6 }
  0x3c   : > { %p1091_p5 = pneg %p1090_p4 }
  0x3e   : > { %p1096_p10 = pnand %p1095_p8, %p1091_p5 }
  0x42   : > { %307 = vxpose.xlu0.b32.cont [3/4] (short) (narrow) %v295_v13, 64 }
  0x4a   : > { %308 = vxpose.xlu0.b32.end [4/4] (short) (narrow) %v296_v15, 64 }
  0xd6   : > { %v321_v16 = vpop.trf.xlu0 }
  0xd7   : > { %832 = vmatmul.msk.f32.vlgmr.msra.gmra.mxu0 %vm337_vm0, %v321_v16 }
  0xde   : > { %v322_v17 = vpop.trf.xlu0 }
  0xdf   : > { %833 = vmatmul.msk.f32.gmra.mxu0 %vm337_vm0, %v322_v17 }
  0xe6   : > { %v323_v18 = vpop.trf.xlu0 }
  0xe7   : > { %834 = vmatmul.msk.f32.gmra.mxu0 %vm337_vm0, %v323_v18 }
  0xee   : > { %v324_v19 = vpop.trf.xlu0 }
  0xef   : > { %835 = vmatmul.msk.f32.gmra.mxu0 %vm337_vm0, %v324_v19 }
  0xf6   : > { %v325_v20 = vpop.trf.xlu0 }
  0xf7   : > { %836 = vmatmul.msk.f32.vlgmr.msra.gmra.mxu2 %vm337_vm0, %v325_v20 }
  0xfe   : > { %v326_v21 = vpop.trf.xlu0 }
  0xff   : > { %837 = vmatmul.msk.f32.gmra.mxu2 %vm337_vm0, %v326_v21 }
 0x106   : > { %v327_v22 = vpop.trf.xlu0 }
 0x107   : > { %838 = vmatmul.msk.f32.gmra.mxu2 %vm337_vm0, %v327_v22 }
 0x10e   : > { %v328_v23 = vpop.trf.xlu0 }
 0x10f   : > { %839 = vmatmul.msk.f32.gmra.mxu2 %vm337_vm0, %v328_v23 }
 0x154   : > { %v1320_v25 = vpop.f32.mrf.mxu0 }
 0x155   : > { %v404_v35 = vsel %vm403_vm1, %v1320_v25, -inf }
 0x15c   : > { %v382_v28 = vpop.f32.mrf.mxu0 }
 0x15d   : > { %v407_v39 = vsel %vm403_vm1, %v382_v28, -inf }
 0x164   : > { %v385_v31 = vpop.f32.mrf.mxu0 }
 0x165   : > { %v410_v33 = vsel %vm403_vm1, %v385_v31, -inf }
 0x16c   : > { %v388_v37 = vpop.f32.mrf.mxu0 }
 0x16d   : > { %v413_v38 = vsel %vm403_vm1, %v388_v37, -inf }
 0x17a   : > { %v391_v24 = vpop.f32.mrf.mxu2 }
 0x17b   : > { %v416_v30 = vsel %vm403_vm1, %v391_v24, -inf }
 0x182   : > { %v394_v26 = vpop.f32.mrf.mxu2 }
 0x183   : > { %v419_v27 = vsel %vm403_vm1, %v394_v26, -inf }
 0x184   : > { %420 = vmax.xlane.f32.xlu2 %v419_v27 }
 0x18a   : > { %v397_v29 = vpop.f32.mrf.mxu2 }
 0x18b   : > { %v422_v36 = vsel %vm403_vm1, %v397_v29, -inf }
 0x18c   : > { %417 = vmax.xlane.f32.xlu2 %v416_v30 }
 0x192   : > { %v400_v32 = vpop.f32.mrf.mxu2 }
 0x193   : > { %v425_v34 = vsel %vm403_vm1, %v400_v32, -inf }
 0x194   : > { %411 = vmax.xlane.f32.xlu2 %v410_v33  ;;  %426 = vmax.xlane.f32.xlu1 %v425_v34 }
 0x19c   : > { %405 = vmax.xlane.f32.xlu2 %v404_v35  ;;  %423 = vmax.xlane.f32.xlu1 %v422_v36 }
 0x1a4   : > { %414 = vmax.xlane.f32.xlu1 %v413_v38 }
 0x1ac   : > { %408 = vmax.xlane.f32.xlu1 %v407_v39 }
 0x1f7   : > { %v421_v40 = vpop.xlane.xlu2 %420 }
 0x1f8   : > { %v433_v41 = vsub.f32 %v394_v26, %v421_v40 }
 0x1fa   : > { %v446_v42 = vmul.f32 1.442695, %v433_v41 }
 0x1fc   : > { %950 = vpow2.f32 %v446_v42 }
 0x1ff   : > { %v418_v48 = vpop.xlane.xlu2 %417 }
 0x200   : > { %v432_v53 = vsub.f32 %v391_v24, %v418_v48 }
 0x202   : > { %v1331_v43 = vpop.eup %950  ;;  %v444_v56 = vmul.f32 1.442695, %v432_v53 }
 0x203   : > { %v467_v44 = vsel %vm403_vm1, %v1331_v43, 0.0 }
 0x204   : > { %468 = vadd.xlane.f32.xlu2 %v467_v44 }
 0x207   : > { %v427_v45 = vpop.xlane.xlu1 %426  ;;  %v412_v55 = vpop.xlane.xlu2 %411 }
 0x208   : > { %v435_v46 = vsub.f32 %v400_v32, %v427_v45  ;;  %v430_v61 = vsub.f32 %v385_v31, %v412_v55 }
 0x20a   : > { %v450_v47 = vmul.f32 1.442695, %v435_v46  ;;  %v440_v63 = vmul.f32 1.442695, %v430_v61 }
 0x20c   : > { %952 = vpow2.f32 %v450_v47 }
 0x20f   : > { %v424_v49 = vpop.xlane.xlu1 %423  ;;  %v406_v1 = vpop.xlane.xlu2 %405 }
 0x210   : > { %v434_v50 = vsub.f32 %v397_v29, %v424_v49  ;;  %v428_v6 = vsub.f32 %v1320_v25, %v406_v1 }
 0x212   : > { %v448_v51 = vmul.f32 1.442695, %v434_v50  ;;  %v1335_v52 = vpop.eup %952  ;;  %v436_v9 = vmul.f32 1.442695, %v428_v6 }
 0x213   : > { %v473_v54 = vsel %vm403_vm1, %v1335_v52, 0.0 }
 0x214   : > { %954 = vpow2.f32 %v448_v51  ;;  %474 = vadd.xlane.f32.xlu0 %v473_v54 }
 0x215   : > { %956 = vpow2.f32 %v444_v56 }
 0x217   : > { %v415_v57 = vpop.xlane.xlu1 %414 }
 0x218   : > { %v431_v58 = vsub.f32 %v388_v37, %v415_v57 }
 0x21a   : > { %v442_v59 = vmul.f32 1.442695, %v431_v58  ;;  %v1339_v60 = vpop.eup %954 }
 0x21b   : > { %v470_v62 = vsel %vm403_vm1, %v1339_v60, 0.0  ;;  %v1343_v3 = vpop.eup %956 }
 0x21c   : > { %958 = vpow2.f32 %v442_v59  ;;  %471 = vadd.xlane.f32.xlu1 %v470_v62  ;;  %v464_v8 = vsel %vm403_vm1, %v1343_v3, 0.0 }
 0x21d   : > { %960 = vpow2.f32 %v440_v63 }
 0x21f   : > { %v409_v0 = vpop.xlane.xlu1 %408 }
 0x220   : > { %v429_v2 = vsub.f32 %v382_v28, %v409_v0 }
 0x222   : > { %v1345_v4 = vpop.eup %958  ;;  %v438_v5 = vmul.f32 1.442695, %v429_v2 }
 0x223   : > { %v461_v7 = vsel %vm403_vm1, %v1345_v4, 0.0  ;;  %v1352_v10 = vpop.eup %960 }
 0x224   : > { %962 = vpow2.f32 %v438_v5  ;;  %462 = vadd.xlane.f32.xlu2 %v461_v7  ;;  %465 = vadd.xlane.f32.xlu1 %v464_v8  ;;  %v458_v13 = vsel %vm403_vm1, %v1352_v10, 0.0 }
 0x225   : > { %964 = vpow2.f32 %v436_v9 }
 0x22a   : > { %v1354_v11 = vpop.eup %962 }
 0x22b   : > { %v455_v12 = vsel %vm403_vm1, %v1354_v11, 0.0  ;;  %v1360_v14 = vpop.eup %964 }
 0x22c   : > { %456 = vadd.xlane.f32.xlu2 %v455_v12  ;;  %459 = vadd.xlane.f32.xlu1 %v458_v13  ;;  %v452_v15 = vsel %vm403_vm1, %v1360_v14, 0.0 }
 0x234   : > { %453 = vadd.xlane.f32.xlu1 %v452_v15 }
 0x277   : > { %v469_v16 = vpop.xlane.xlu2 %468 }
 0x278   : > { %966 = vrcp.f32 %v469_v16  ;;  %vm556_vm7 = vweird.f32 %v469_v16  ;;  %v562_v41 = vand.u32 2147483648, %v469_v16  ;;  %v560_v47 = vand.u32 2147483647, %v469_v16 }
 0x27a   : > { %v563_v55 = vor.u32 1.1754944e-38, %v562_v41  ;;  %vm561_vm13 = vcmp.eq.f32.partialorder %v560_v47, 8.507059e+37 }
 0x27e   : > { %v1364_v18 = vpop.eup %966 }
 0x27f   : > { %v552_v20 = vmul.f32 %v1364_v18, %v469_v16  ;;  %vm557_vm6 = vweird.f32 %v1364_v18 }
 0x280   : > { %vm1385_vm9 = vmor %vm556_vm7, %vm557_vm6 }
 0x281   : > { %v553_v24 = vsub.f32 1.0, %v552_v20 }
 0x283   : > { %v554_v31 = vmul.f32 %v1364_v18, %v553_v24 }
 0x285   : > { %v555_v40 = vadd.f32 %v1364_v18, %v554_v31 }
 0x287   : > { %v475_v17 = vpop.xlane.xlu0 %474  ;;  %v559_v54 = vsel %vm1385_vm9, %v1364_v18, %v555_v40 }
 0x288   : > { %968 = vrcp.f32 %v475_v17  ;;  %v592_v26 = vand.u32 2147483648, %v475_v17  ;;  %v590_v27 = vand.u32 2147483647, %v475_v17  ;;  %vm586_vm3 = vweird.f32 %v475_v17 }
 0x289   : > { %v564_v63 = vsel %vm561_vm13, %v563_v55, %v559_v54  ;;  %v597_v54 = vld [vmem:[%s255_s18 + $0x8] sm:$0xff] }
 0x28a   : > { %v593_v32 = vor.u32 1.1754944e-38, %v592_v26  ;;  %vm591_vm5 = vcmp.eq.f32.partialorder %v590_v27, 8.507059e+37  ;;  %v565_v13 = vmul.f32 %v1331_v43, %v564_v63 }
 0x28e   : > { %v969_v19 = vpop.eup %968 }
 0x28f   : > { %v582_v21 = vmul.f32 %v969_v19, %v475_v17  ;;  %v472_v22 = vpop.xlane.xlu1 %471  ;;  %vm587_vm2 = vweird.f32 %v969_v19 }
 0x290   : > { %970 = vrcp.f32 %v472_v22  ;;  %vm588_vm4 = vmor %vm586_vm3, %vm587_vm2  ;;  %v577_v42 = vand.u32 2147483648, %v472_v22  ;;  %v575_v46 = vand.u32 2147483647, %v472_v22  ;;  %vm571_vm10 = vweird.f32 %v472_v22 }
 0x291   : > { %v583_v23 = vsub.f32 1.0, %v582_v21 }
 0x292   : > { %v578_v56 = vor.u32 1.1754944e-38, %v577_v42  ;;  %vm576_vm12 = vcmp.eq.f32.partialorder %v575_v46, 8.507059e+37 }
 0x293   : > { %v584_v25 = vmul.f32 %v969_v19, %v583_v23 }
 0x295   : > { %v585_v28 = vadd.f32 %v969_v19, %v584_v25 }
 0x296   : > { %v971_v29 = vpop.eup %970 }
 0x297   : > { %v1367_v30 = vpop.xlane.xlu2 %462  ;;  %v567_v33 = vmul.f32 %v971_v29, %v472_v22  ;;  %v1371_v34 = vpop.xlane.xlu1 %465  ;;  %v589_v35 = vsel %vm588_vm4, %v969_v19, %v585_v28  ;;  %vm572_vm8 = vweird.f32 %v971_v29 }
 0x298   : > { %972 = vrcp.f32 %v1367_v30  ;;  %v594_v37 = vsel %vm591_vm5, %v593_v32, %v589_v35  ;;  %vm573_vm11 = vmor %vm571_vm10, %vm572_vm8  ;;  %v547_v1 = vand.u32 2147483648, %v1371_v34  ;;  %v545_v5 = vand.u32 2147483647, %v1371_v34 }
 0x299   : > { %974 = vrcp.f32 %v1371_v34  ;;  %v568_v36 = vsub.f32 1.0, %v567_v33  ;;  %v595_v38 = vmul.f32 %v1335_v52, %v594_v37  ;;  %vm541_vm15 = vweird.f32 %v1371_v34 }
 0x29a   : > { %vm526_vm2 = vweird.f32 %v1367_v30  ;;  %v548_v15 = vor.u32 1.1754944e-38, %v547_v1  ;;  %v530_v19 = vand.u32 2147483647, %v1367_v30  ;;  %vm546_vm4 = vcmp.eq.f32.partialorder %v545_v5, 8.507059e+37 }
 0x29b   : > { %v569_v39 = vmul.f32 %v971_v29, %v568_v36  ;;  %840 = vmatpush.xpose.msk.msra.mxu1 %vm403_vm1, %v595_v38  ;;  %865 = vmatpush.xpose.msk.msra.mxu3 %vm403_vm1, %v595_v38 }
 0x29c   : > { %vm531_vm6 = vcmp.eq.f32.partialorder %v530_v19, 8.507059e+37 }
 0x29d   : > { %v570_v45 = vadd.f32 %v971_v29, %v569_v39 }
 0x29e   : > { %v1379_v44 = vpop.eup %972 }
 0x29f   : > { %v975_v48 = vpop.eup %974  ;;  %v522_v49 = vmul.f32 %v1379_v44, %v1367_v30  ;;  %v1383_v50 = vpop.xlane.xlu2 %456  ;;  %v574_v59 = vsel %vm573_vm11, %v971_v29, %v570_v45  ;;  %vm527_vm0 = vweird.f32 %v1379_v44 }
 0x2a0   : > { %v537_v52 = vmul.f32 %v975_v48, %v1371_v34  ;;  %976 = vrcp.f32 %v1383_v50  ;;  %v1391_v53 = vpop.xlane.xlu1 %459  ;;  %v579_v62 = vsel %vm576_vm12, %v578_v56, %v574_v59  ;;  %vm542_vm14 = vweird.f32 %v975_v48  ;;  %vm528_vm5 = vmor %vm526_vm2, %vm527_vm0 }
 0x2a1   : > { %v523_v57 = vsub.f32 1.0, %v522_v49  ;;  %978 = vrcp.f32 %v1391_v53  ;;  %v580_v2 = vmul.f32 %v1339_v60, %v579_v62  ;;  %v532_v60 = vand.u32 2147483648, %v1367_v30  ;;  %vm543_vm3 = vmor %vm541_vm15, %vm542_vm14 }
 0x2a2   : > { %v538_v58 = vsub.f32 1.0, %v537_v52  ;;  %v517_v25 = vand.u32 2147483648, %v1391_v53  ;;  %v515_v28 = vand.u32 2147483647, %v1391_v53  ;;  %vm511_vm9 = vweird.f32 %v1391_v53  ;;  %v598_v52 = vld [vmem:[%s255_s18 + $0x10] sm:$0xff] }
 0x2a3   : > { %v524_v61 = vmul.f32 %v1379_v44, %v523_v57  ;;  %841 = vmatpush.xpose.msk.msra.mxu1 %vm403_vm1, %v580_v2  ;;  %866 = vmatpush.xpose.msk.msra.mxu3 %vm403_vm1, %v580_v2  ;;  %v533_v23 = vor.u32 1.1754944e-38, %v532_v60  ;;  %vm496_vm10 = vweird.f32 %v1383_v50  ;;  %v502_v33 = vand.u32 2147483648, %v1383_v50 }
 0x2a4   : > { %v539_v0 = vmul.f32 %v975_v48, %v538_v58  ;;  %v518_v34 = vor.u32 1.1754944e-38, %v517_v25  ;;  %vm516_vm12 = vcmp.eq.f32.partialorder %v515_v28, 8.507059e+37 }
 0x2a5   : > { %v525_v8 = vadd.f32 %v1379_v44, %v524_v61  ;;  %v503_v42 = vor.u32 1.1754944e-38, %v502_v33 }
 0x2a6   : > { %v1402_v6 = vpop.eup %976  ;;  %v540_v7 = vadd.f32 %v975_v48, %v539_v0 }
 0x2a7   : > { %v979_v9 = vpop.eup %978  ;;  %v492_v12 = vmul.f32 %v1402_v6, %v1383_v50  ;;  %842 = vmatpush.xpose.msk.msra.mxu1 %vm403_vm1, %v565_v13  ;;  %867 = vmatpush.xpose.msk.msra.mxu3 %vm403_vm1, %v565_v13  ;;  %v529_v22 = vsel %vm528_vm5, %v1379_v44, %v525_v8  ;;  %vm497_vm8 = vweird.f32 %v1402_v6 }
 0x2a8   : > { %v507_v16 = vmul.f32 %v979_v9, %v1391_v53  ;;  %v454_v17 = vpop.xlane.xlu1 %453  ;;  %v544_v18 = vsel %vm543_vm3, %v975_v48, %v540_v7  ;;  %vm512_vm7 = vweird.f32 %v979_v9  ;;  %v534_v29 = vsel %vm531_vm6, %v533_v23, %v529_v22  ;;  %vm498_vm13 = vmor %vm496_vm10, %vm497_vm8  ;;  %v596_v53 = vld [vmem:[%s255_s18] sm:$0xff] }
 0x2a9   : > { %v493_v20 = vsub.f32 1.0, %v492_v12  ;;  %980 = vrcp.f32 %v454_v17  ;;  %v549_v43 = vsel %vm546_vm4, %v548_v15, %v544_v18  ;;  %vm513_vm11 = vmor %vm511_vm9, %vm512_vm7  ;;  %v535_v36 = vmul.f32 %v1345_v4, %v534_v29 }
 0x2aa   : > { %v508_v21 = vsub.f32 1.0, %v507_v16  ;;  %v550_v26 = vmul.f32 %v1343_v3, %v549_v43  ;;  %v500_v3 = vand.u32 2147483647, %v1383_v50  ;;  %v487_v44 = vand.u32 2147483648, %v454_v17 }
 0x2ab   : > { %v494_v24 = vmul.f32 %v1402_v6, %v493_v20  ;;  %v485_v4 = vand.u32 2147483647, %v454_v17  ;;  %vm481_vm0 = vweird.f32 %v454_v17 }
 0x2ac   : > { %v509_v27 = vmul.f32 %v979_v9, %v508_v21  ;;  %843 = vmatpush.xpose.msk.msra.mxu1 %vm403_vm1, %v550_v26  ;;  %868 = vmatpush.xpose.msk.msra.mxu3 %vm403_vm1, %v550_v26  ;;  %vm501_vm14 = vcmp.eq.f32.partialorder %v500_v3, 8.507059e+37  ;;  %v488_v48 = vor.u32 1.1754944e-38, %v487_v44 }
 0x2ad   : > { %v495_v30 = vadd.f32 %v1402_v6, %v494_v24  ;;  %vm486_vm3 = vcmp.eq.f32.partialorder %v485_v4, 8.507059e+37 }
 0x2ae   : > { %v510_v31 = vadd.f32 %v979_v9, %v509_v27 }
 0x2af   : > { %v981_v32 = vpop.eup %980  ;;  %v499_v41 = vsel %vm498_vm13, %v1402_v6, %v495_v30 }
 0x2b0   : > { %v477_v35 = vmul.f32 %v981_v32, %v454_v17  ;;  %v514_v37 = vsel %vm513_vm11, %v979_v9, %v510_v31  ;;  %844 = vmatpush.xpose.msk.msra.mxu1 %vm403_vm1, %v535_v36  ;;  %869 = vmatpush.xpose.msk.msra.mxu3 %vm403_vm1, %v535_v36  ;;  %vm482_vm15 = vweird.f32 %v981_v32  ;;  %v504_v46 = vsel %vm501_vm14, %v503_v42, %v499_v41 }
 0x2b1   : > { %v519_v38 = vsel %vm516_vm12, %v518_v34, %v514_v37  ;;  %vm483_vm2 = vmor %vm481_vm0, %vm482_vm15 }
 0x2b2   : > { %v478_v39 = vsub.f32 1.0, %v477_v35  ;;  %v520_v40 = vmul.f32 %v1352_v10, %v519_v38  ;;  %v505_v10 = vmul.f32 %v1354_v11, %v504_v46  ;;  %v599_v11 = vld [vmem:[%s255_s18 + $0x18] sm:$0xff] }
 0x2b4   : > { %v479_v45 = vmul.f32 %v981_v32, %v478_v39  ;;  %845 = vmatpush.xpose.msk.msra.mxu1 %vm403_vm1, %v520_v40  ;;  %870 = vmatpush.xpose.msk.msra.mxu3 %vm403_vm1, %v520_v40 }
 0x2b6   : > { %v480_v47 = vadd.f32 %v981_v32, %v479_v45 }
 0x2b8   : > { %v484_v49 = vsel %vm483_vm2, %v981_v32, %v480_v47  ;;  %846 = vmatpush.xpose.msk.msra.mxu1 %vm403_vm1, %v505_v10  ;;  %871 = vmatpush.xpose.msk.msra.mxu3 %vm403_vm1, %v505_v10 }
 0x2b9   : > { %v489_v50 = vsel %vm486_vm3, %v488_v48, %v484_v49 }
 0x2ba   : > { %v490_v51 = vmul.f32 %v1360_v14, %v489_v50 }
 0x2bc   : > { %847 = vmatpush.xpose.msk.msra.mxu1 %vm403_vm1, %v490_v51  ;;  %872 = vmatpush.xpose.msk.msra.mxu3 %vm403_vm1, %v490_v51 }
 0x2bf   : > { %850 = vmatmul.msk.f32.vlgmr.msra.gmra.mxu3 %vm403_vm1, %v598_v52  ;;  %848 = vmatmul.msk.f32.vlgmr.msra.gmra.mxu1 %vm403_vm1, %v596_v53 }
 0x2c7   : > { %851 = vmatmul.msk.f32.gmra.mxu3 %vm403_vm1, %v599_v11  ;;  %849 = vmatmul.msk.f32.gmra.mxu1 %vm403_vm1, %v597_v54 }
 0x33c   : > { %v653_v55 = vpop.f32.mrf.mxu1 }
 0x33d   : > { %665 = vst.msk [vmem:[%s288_s24] sm:$0xff] %vm403_vm1, %v653_v55 }
 0x342   : > { %v659_v14 = vpop.f32.mrf.mxu3 }
 0x343   : > { %667 = vst.msk [vmem:[%s288_s24 + $0x10] sm:$0xff] %vm403_vm1, %v659_v14 }
 0x344   : > { %v656_v56 = vpop.f32.mrf.mxu1 }
 0x345   : > { %666 = vst.msk [vmem:[%s288_s24 + $0x8] sm:$0xff] %vm403_vm1, %v656_v56 }
 0x34a   : > { %v662_v57 = vpop.f32.mrf.mxu3 }
 0x34b   : > { %668 = vst.msk [vmem:[%s288_s24 + $0x18] sm:$0xff] %vm403_vm1, %v662_v57 }
 0x34c   : > { %1099 = shalt.err (!%p1096_p10)
}
 0x34d   : > { %s1162_s11 = smov 128   ;;  %s1163_s1 = smov 8  }
 0x34e   : > { %879 = dma.vmem_to_hbm [thread:$0]  (%p1239_p9), %s684_s21, 512, %s686_s22, %s670_s23, %s1162_s11, %s1162_s11, %s1163_s1  }
 0x34f PF: > { %p896_p12 = scmp.ge.s32.totalorder %s1158_s17, 2  ;;  %s700_s28 = sand.u32 1, %s1138_s12  }
 0x350   : > { %s701_s16 = scalar_lea.sflag [#allocation4], %s700_s28 }
 0x351   : > { %p892_p13 = pnand %p896_p12, %p1246_p11 }
 0x353   : > { %p893_p0 = pneg %p892_p13 }
 0x355   : > { %1133 = dma.done.wait (%p893_p0), %s701_s16, 512  }
 0x356   : > { %1135 = vsyncadd (%p893_p0), %s701_s16, 4294966784  ;;  %s22_s17 = sadd.s32 1, %s1158_s17   ;;  %s1519_s14 = sld [smem:[#allocation12_spill]] }
 0x357   : > { %p19_p1 = scmp.ge.s32.totalorder %s22_s17, 10   ;;  %s1520_s26 = sld [smem:[#allocation15_spill]] }
 0x358   : > { %s1521_s15 = sld [smem:[#allocation13_spill]]  ;;  %s1523_s12 = smov %s1142_s13 }
 0x359   : > { %s1522_s16 = sld [smem:[#allocation14_spill]]  ;;  %21 = sbr.rel (!%p19_p1) target bundleno = 10 (0xa), region = 101 }
 0x35c   : > { %s1524_s13 = smov %s1519_s14 }
 0x35d   : > { %s1525_s14 = smov %s1520_s26 }
 0x35e   :  { %707 = vsyncpa [#allocation3], 1 }
 0x35f   :  { %709 = vsyncpa [#allocation3 + $0x1], 1 }
 0x360   :  { %710 = vsyncpa [#allocation6], 1 }
 0x361   :  { %712 = vsyncpa [#allocation6 + $0x1], 1 }
 0x362   :  { %713 = vsyncpa [#allocation4], 1 }
 0x363   :  { %715 = vsyncpa [#allocation4 + $0x1], 1 }

</bundles_post_ra>
